<compile_context>
chip_gen: v5e
topology: v5e:2x2
jax: 0.10.0
libtpu: 0.0.40
codegen_flags: <defaults>
</compile_context>

<pallas_src>
import jax
import jax.numpy as jnp
from jax.experimental import pallas as pl
from jax.experimental.pallas import tpu as pltpu

_LANE = 128
_SUB = 8


def _cdiv(a: int, b: int) -> int:
    return -(-a // b)


def _color_jitter_kernel(sb_ref, img_ref, out_ref):
    # sb_ref: (2, row_tile, 1) f32 -> plane 0 = scale (=1/std), plane 1 = bias (=-mean/std)
    # img_ref/out_ref: (row_tile, col_tile)
    scale = sb_ref[0]  # (row_tile, 1), broadcasts along lanes
    bias = sb_ref[1]
    out_ref[...] = (img_ref[...] * scale + bias).astype(out_ref.dtype)


def _choose_tiles(rows: int, cols: int, itemsize: int, *,
                  budget_bytes: int = 6 << 20,
                  min_block_bytes: int = 256 << 10,
                  target_steps: int = 8):
    """Pick (row_tile, col_tile): row_tile % 8 == 0 (or == rows), col_tile % 128 == 0
    (or == cols), block <= budget, and >= target_steps grid steps when feasible."""
    # Lane (last) axis: multiple of 128 (capped), or full width when short.
    if cols < _LANE:
        col_tile = cols
    else:
        col_tile = min((cols // _LANE) * _LANE, 16 * _LANE)

    # Sublane axis: multiple of 8 sized to the budget, or full height when short.
    if rows < _SUB:
        row_tile = rows
    else:
        per_row_bytes = max(col_tile * itemsize, 1)
        row_tile = max(_SUB, (budget_bytes // per_row_bytes) // _SUB * _SUB)
        row_tile = min(row_tile, (rows // _SUB) * _SUB)

    def n_steps(rt, ct):
        return _cdiv(rows, rt) * _cdiv(cols, ct)

    # Keep the grid from collapsing to one fat step (pipelining + v7x megacore),
    # as long as blocks stay reasonably large.
    while n_steps(row_tile, col_tile) < target_steps:
        nxt_row = max(_SUB, (row_tile // 2) // _SUB * _SUB)
        nxt_col = max(_LANE, (col_tile // 2) // _LANE * _LANE)
        if row_tile > _SUB and nxt_row * col_tile * itemsize >= min_block_bytes:
            row_tile = nxt_row
        elif col_tile > _LANE and row_tile * nxt_col * itemsize >= min_block_bytes:
            col_tile = nxt_col
        else:
            break
    return row_tile, col_tile


def _color_jitter_pallas_2d(img2d, scale_bias, out_dtype, row_tile, col_tile):
    rows, cols = img2d.shape
    grid = (_cdiv(rows, row_tile), _cdiv(cols, col_tile))
    in_bytes = rows * cols * jnp.dtype(img2d.dtype).itemsize
    out_bytes = rows * cols * jnp.dtype(out_dtype).itemsize
    param_bytes = scale_bias.size * jnp.dtype(scale_bias.dtype).itemsize
    cost = pl.CostEstimate(
        flops=2 * rows * cols,
        transcendentals=0,
        bytes_accessed=in_bytes + out_bytes + param_bytes,
    )
    return pl.pallas_call(
        _color_jitter_kernel,
        out_shape=jax.ShapeDtypeStruct((rows, cols), out_dtype),
        grid_spec=pltpu.PrefetchScalarGridSpec(
            num_scalar_prefetch=0,
            grid=grid,
            in_specs=[
                # packed per-row params: (2, row_tile, 1), resident across lane tiles
                pl.BlockSpec((2, row_tile, 1), lambda i, j: (0, i, 0)),
                # lane-dense image tile
                pl.BlockSpec((row_tile, col_tile), lambda i, j: (i, j)),
            ],
            out_specs=pl.BlockSpec((row_tile, col_tile), lambda i, j: (i, j)),
        ),
        compiler_params=pltpu.CompilerParams(
            dimension_semantics=("parallel", "parallel"),
            vmem_limit_bytes=48 * 1024 * 1024,
        ),
        cost_estimate=cost,
    )(scale_bias, img2d)


def color_jitter(img: jax.Array, mean: jax.Array, std: jax.Array, *,
                 out_dtype=None, force_pallas: bool = False) -> jax.Array:
    """img: (B, C, H, W); mean/std: (B, C, 1, 1) or (B, C)."""
    B, C, H, W = img.shape
    out_dtype = jnp.dtype(img.dtype if out_dtype is None else out_dtype)
    rows, cols = B * C, H * W
    itemsize = jnp.dtype(img.dtype).itemsize

    mean_col = mean.reshape(rows, 1).astype(jnp.float32)
    std_col = std.reshape(rows, 1).astype(jnp.float32)

    # Tiny inputs: custom-call launch + grid prologue dominate; let XLA fuse.
    if rows * cols * itemsize < (1 << 20) and not force_pallas:
        mean_b = mean_col.reshape(B, C, 1, 1)
        std_b = std_col.reshape(B, C, 1, 1)
        return ((img - mean_b) / std_b).astype(out_dtype)

    scale = 1.0 / std_col                    # (rows, 1) f32, exact reciprocal once
    bias = -mean_col * scale                 # (rows, 1) f32
    scale_bias = jnp.stack([scale, bias], axis=0)   # (2, rows, 1)

    img2d = img.reshape(rows, cols)          # free: NCHW is contiguous
    row_tile, col_tile = _choose_tiles(rows, cols, itemsize)
    out2d = _color_jitter_pallas_2d(img2d, scale_bias, out_dtype, row_tile, col_tile)
    return out2d.reshape(B, C, H, W)


class ColorJitterPallas:
    """Mirrors prepost.ColorJitter: holds (B, 3, 1, 1) mean/std buffers."""

    def __init__(self, batch_size: int, shuffle_every: bool = False,
                 mean: float = 1.0, std: float = 1.0, *, key=None,
                 force_pallas: bool = False, out_dtype=None):
        self.batch_size = batch_size
        self.mean_p = mean
        self.std_p = std
        self.shuffle_every = shuffle_every
        self.force_pallas = force_pallas
        self.out_dtype = out_dtype
        self._key = key if key is not None else jax.random.PRNGKey(0)
        self.mean = None
        self.std = None
        self.shuffle()

    def shuffle(self):
        self._key, k1, k2 = jax.random.split(self._key, 3)
        u_mean = jax.random.uniform(k1, (self.batch_size, 3, 1, 1), jnp.float32)
        u_std = jax.random.uniform(k2, (self.batch_size, 3, 1, 1), jnp.float32)
        self.mean = (u_mean - 0.5) * 2.0 * self.mean_p
        self.std = jnp.exp((u_std - 0.5) * 2.0 * self.std_p)

    def __call__(self, img: jax.Array) -> jax.Array:
        if self.shuffle_every:
            # TODO(synk): stateful per-forward reshuffle has no in-kernel
            # equivalent; params are regenerated here in plain JAX (do not
            # close over them under jax.jit).
            self.shuffle()
        return color_jitter(img, self.mean, self.std,
                            out_dtype=self.out_dtype,
                            force_pallas=self.force_pallas)


if __name__ == "__main__":
    key = jax.random.PRNGKey(0)
    k_img, k_mod, k_img2, k_mod2 = jax.random.split(key, 4)

    # Small test case (forces the Pallas path; single-block grid).
    B, C, H, W = 2, 3, 16, 16
    img = jax.random.normal(k_img, (B, C, H, W), dtype=jnp.float32)
    module = ColorJitterPallas(batch_size=B, shuffle_every=False,
                               mean=1.0, std=1.0, key=k_mod, force_pallas=True)
    out = jax.block_until_ready(module(img))
    ref = (img - module.mean) / module.std
    assert out.shape == (B, C, H, W)
    assert jnp.allclose(out, ref, atol=1e-5, rtol=1e-5)

    # Second case exercising the 2-D multi-step grid and a masked last row
    # block (rows = 12 is not a multiple of 8).
    B2, C2, H2, W2 = 4, 3, 32, 256
    img2 = jax.random.normal(k_img2, (B2, C2, H2, W2), dtype=jnp.float32)
    module2 = ColorJitterPallas(batch_size=B2, shuffle_every=False,
                                mean=1.0, std=1.0, key=k_mod2, force_pallas=True)
    out2 = jax.block_until_ready(module2(img2))
    ref2 = (img2 - module2.mean) / module2.std
    assert out2.shape == (B2, C2, H2, W2)
    assert jnp.allclose(out2, ref2, atol=1e-5, rtol=1e-5)

    print("KERNEL_OK")
</pallas_src>

<mosaic_0001>
module attributes {stable_mosaic.version = 11 : i64} {
  func.func @_color_jitter_kernel(%arg0: i32, %arg1: i32, %arg2: memref<2x6x1xf32, #tpu.memory_space<vmem>>, %arg3: memref<6x256xf32, #tpu.memory_space<vmem>>, %arg4: memref<6x256xf32, #tpu.memory_space<vmem>>) attributes {dimension_semantics = [#tpu.dimension_semantics<parallel>, #tpu.dimension_semantics<parallel>], iteration_bounds = array<i64: 1, 1>, scalar_prefetch = 0 : i64, scratch_operands = 0 : i64, tpu.core_type = #tpu.core_type<tc>, window_params = [{transform_indices = @transform_0, window_bounds = array<i64: 2, 6, 1>}, {transform_indices = @transform_1, window_bounds = array<i64: 6, 256>}, {transform_indices = @transform_2, window_bounds = array<i64: 6, 256>}]} {
    %c0 = arith.constant 0 : index
    %c0_0 = arith.constant 0 : index
    %c0_1 = arith.constant 0 : index
    %0 = vector.load %arg2[%c0, %c0_0, %c0_1] : memref<2x6x1xf32, #tpu.memory_space<vmem>>, vector<1x6x1xf32>
    %1 = vector.shape_cast %0 : vector<1x6x1xf32> to vector<6x1xf32>
    %c1 = arith.constant 1 : index
    %c0_2 = arith.constant 0 : index
    %c0_3 = arith.constant 0 : index
    %2 = vector.load %arg2[%c1, %c0_2, %c0_3] : memref<2x6x1xf32, #tpu.memory_space<vmem>>, vector<1x6x1xf32>
    %3 = vector.shape_cast %2 : vector<1x6x1xf32> to vector<6x1xf32>
    %c0_4 = arith.constant 0 : index
    %c0_5 = arith.constant 0 : index
    %4 = vector.load %arg3[%c0_4, %c0_5] : memref<6x256xf32, #tpu.memory_space<vmem>>, vector<6x256xf32>
    %5 = vector.broadcast %1 : vector<6x1xf32> to vector<6x256xf32>
    %6 = arith.mulf %4, %5 : vector<6x256xf32>
    %7 = vector.broadcast %3 : vector<6x1xf32> to vector<6x256xf32>
    %8 = arith.addf %6, %7 : vector<6x256xf32>
    %c0_6 = arith.constant 0 : index
    %c0_7 = arith.constant 0 : index
    %9 = vector.load %arg4[%c0_6, %c0_7] : memref<6x256xf32, #tpu.memory_space<vmem>>, vector<6x256xf32>
    tpu.vector_store %arg4[%c0_6, %c0_7], %8 {strides = array<i32>} : memref<6x256xf32, #tpu.memory_space<vmem>>, vector<6x256xf32>,
    return
  }
  func.func @transform_0(%arg0: i32, %arg1: i32) -> (i32, i32, i32) {
    %c0_i32 = arith.constant 0 : i32
    %c0_i32_0 = arith.constant 0 : i32
    %c0_i32_1 = arith.constant 0 : i32
    return %c0_i32, %arg0, %c0_i32_0 : i32, i32, i32
  }
  func.func @transform_1(%arg0: i32, %arg1: i32) -> (i32, i32) {
    %c0_i32 = arith.constant 0 : i32
    return %arg0, %arg1 : i32, i32
  }
  func.func @transform_2(%arg0: i32, %arg1: i32) -> (i32, i32) {
    %c0_i32 = arith.constant 0 : i32
    return %arg0, %arg1 : i32, i32
  }
}

</mosaic_0001>

<bundles_post_ra>
// kernel: tpu_custom_call.1
= control target key start
LH: loop header
LB: loop body
LE: loop exit
PB: predicated region body
PF: predicated region fallthrough
CT: control target
= control target key end

     0   :  { %v79_v1 = vmov 0   ;;  %s111_s0 = inlined_call_operand.vmem [shape: f32[2,6,1], index: 0, kind: input, shape index: {}]   ;;  %s112_s1 = inlined_call_operand.vmem [shape: f32[6,256], index: 1, kind: input, shape index: {}]   ;;  %s113_s2 = inlined_call_operand.hbm [shape: f32[6,256], index: 2, kind: output, shape index: {}]  }
   0x1   :  { %v12_v0 = vld [vmem:[%s111_s0] sm:$0x3f]  ;;  %52 = vset.pattern.permute.xlu0 %v79_v1 }
   0x2   :  { %7 = vsyncpa [#allocation3], 0  ;;  %19 = vperm.xlu0 %52, %v12_v0   ;;  %v49_v2 = vld [vmem:[%s111_s0 + $0x8] sm:$0x3f]  ;;  %v15_v4 = vld [vmem:[%s112_s1] sm:$0x3f] }
   0x3   :  { %v16_v5 = vld [vmem:[%s112_s1 + $0x8] sm:$0x3f]  ;;  %s80_s17 = smov [#allocation2]   ;;  %s40_s21 = sshll.u32 %s113_s2, 4  ;;  %s41_s21 = int_to_ptr.hbm [resolvable:$true] %s40_s21 }
   0x4   :  { %s38_s18 = sshll.u32 %s80_s17, 4  ;;  %s39_s18 = int_to_ptr.vmem [resolvable:$true] %s38_s18 }
   0xa   :  { %26 = vperm.xlu0 %52, %v49_v2  }
  0x74   :  { %v20_v3 = vpop.permute.xlu0 %19 }
  0x75   :  { %v22_v6 = vmul.f32 %v20_v3, %v15_v4  ;;  %v23_v7 = vmul.f32 %v20_v3, %v16_v5 }
  0x7c   :  { %v27_v8 = vpop.permute.xlu0 %26 }
  0x7d   :  { %v29_v9 = vadd.f32 %v27_v8, %v22_v6  ;;  %v30_v10 = vadd.f32 %v27_v8, %v23_v7 }
  0x7f   :  { %31 = vst [vmem:[#allocation2] sm:$0x3f] %v29_v9 }
  0x80   :  { %32 = vst [vmem:[#allocation2 + $0x8] sm:$0x3f] %v30_v10 }
  0x81   :  { %43 = dma.vmem_to_hbm [thread:$0]  %s39_s18, 256, %s41_s21, [#allocation3]  }
  0x82   :  { %77 = dma.done.wait [#allocation3], 256  }
  0x83   :  { %78 = vsyncadd [#allocation3], 4294967040 }
  0x84   :  { %48 = vsyncpa [#allocation3], 1 }

</bundles_post_ra>
